<compile_context>
chip_gen: v5e
topology: v5e:2x2
jax: 0.10.0
libtpu: 0.0.40
codegen_flags: <defaults>
</compile_context>

<pallas_src>
import functools
import math

import jax
import jax.numpy as jnp
from jax.experimental import pallas as pl
from jax.experimental.pallas import tpu as pltpu

_INV_SQRT2 = 0.7071067811865475
_SQRT_2_OVER_PI = 0.7978845608028654
_GELU_C = 0.044715


def _gelu_tanh(v):
    """tanh-approx GELU. Polynomial stays in v.dtype (bf16 -> packed VALU); the
    transcendental runs on the EUP in f32 (safe lowering on all generations)."""
    u = _SQRT_2_OVER_PI * (v + _GELU_C * (v * v * v))
    t = jnp.tanh(u.astype(jnp.float32)).astype(v.dtype)
    return 0.5 * v * (1.0 + t)


def _gelu_erf(v):
    """torch.nn.GELU() default (exact, erf-based); f32 math (heavier on the VALU)."""
    vf = v.astype(jnp.float32)
    return (0.5 * vf * (1.0 + jax.lax.erf(vf * _INV_SQRT2))).astype(v.dtype)


def fc_discriminator_kernel(x_ref,
                            w1_ref, b1_ref,
                            w2_ref, b2_ref,
                            w3_ref, b3_ref,
                            w4_ref, b4_ref,
                            o_ref, *, gelu):
    # x arrives f32 straight from HBM; cast to bf16 on the VPU (MXU-native operand).
    x = x_ref[...].astype(jnp.bfloat16)                              # (tb, 100)

    # Layer 1: h1^T = W1 . x^T -> (50, tb). lhs (50,100) is plain (M,K); x is the
    # (N,K)-form rhs (MXU transpose_rhs path; no materialized XLU transpose of the
    # big x tile). Batch lives on the 128-lane axis from here on.
    h = jax.lax.dot_general(w1_ref[...], x, (((1,), (1,)), ((), ())),
                            preferred_element_type=jnp.float32)      # (50, tb) f32
    h = gelu((h + b1_ref[...]).astype(jnp.bfloat16))                 # (50, tb) bf16
    # Dropout(p=0.1): eval/inference semantics == identity.

    # Layer 2: (25, tb); bf16 operands, f32 accumulation.
    h = jnp.dot(w2_ref[...], h, preferred_element_type=jnp.float32)
    h = gelu((h + b2_ref[...]).astype(jnp.bfloat16))

    # Layer 3: (5, tb)
    h = jnp.dot(w3_ref[...], h, preferred_element_type=jnp.float32)
    h = gelu((h + b3_ref[...]).astype(jnp.bfloat16))

    # Layer 4 (5 -> 1): VPU multiply + sublane (XLU) reduce; skips a padded MXU matmul.
    logits = jnp.sum(w4_ref[...] * h.astype(jnp.float32), axis=0, keepdims=True)
    o_ref[...] = jax.nn.sigmoid(logits + b4_ref[...])                # (1, tb) f32, lane-dense


def _round_up(n, m):
    return ((n + m - 1) // m) * m


def fc_discriminator(x, params, *, tile_b=8192, approximate_gelu=True):
    """x: (B, 100) float32. Returns (B,) float32 == torch.flatten(model(x)) in eval mode."""
    B, F = x.shape
    assert F == 100
    (w1, b1), (w2, b2), (w3, b3), (w4, b4) = params   # torch layout: W (out,in), b (out,)

    # Batch tile: multiple of 128 (lane width); cap so large B yields >=4 grid steps
    # (keeps both v7x TensorCores fed via dimension_semantics=("parallel",)).
    tb = max(128, min(_round_up(tile_b, 128), _round_up(pl.cdiv(B, 4), 128)))
    grid = (pl.cdiv(B, tb),)

    # Weights/biases are tiny: cast once, full-array blocks with constant index_maps
    # keep them VMEM-resident across all grid steps (only x / out are pipelined).
    w1k = w1.astype(jnp.bfloat16)                      # (50, 100)
    w2k = w2.astype(jnp.bfloat16)                      # (25, 50)
    w3k = w3.astype(jnp.bfloat16)                      # (5, 25)
    b1k = b1.reshape(-1, 1).astype(jnp.float32)        # (50, 1)
    b2k = b2.reshape(-1, 1).astype(jnp.float32)        # (25, 1)
    b3k = b3.reshape(-1, 1).astype(jnp.float32)        # (5, 1)
    w4k = w4.reshape(-1, 1).astype(jnp.float32)        # (5, 1)
    b4k = b4.reshape(1, 1).astype(jnp.float32)         # (1, 1)
    param_arrays = [w1k, b1k, w2k, b2k, w3k, b3k, w4k, b4k]

    def full_block(a):
        return pl.BlockSpec(a.shape, lambda i: (0, 0))

    param_bytes = sum(int(a.size) * a.dtype.itemsize for a in param_arrays)
    cost = pl.CostEstimate(
        flops=2 * B * (100 * 50 + 50 * 25 + 25 * 5 + 5),
        transcendentals=B * (50 + 25 + 5 + 1),
        bytes_accessed=B * (100 * 4 + 4) + param_bytes,
    )

    kernel = functools.partial(
        fc_discriminator_kernel,
        gelu=_gelu_tanh if approximate_gelu else _gelu_erf)

    out = pl.pallas_call(
        kernel,
        out_shape=jax.ShapeDtypeStruct((1, B), jnp.float32),
        grid=grid,
        in_specs=[pl.BlockSpec((tb, 100), lambda i: (i, 0))] +
                 [full_block(a) for a in param_arrays],
        out_specs=pl.BlockSpec((1, tb), lambda i: (0, i)),
        compiler_params=pltpu.CompilerParams(
            dimension_semantics=("parallel",),
            # Explicit scoped-VMEM bump: above v5e's 16 MiB default, under v7x's
            # 64 MiB physical; plenty for tb up to ~16K rows.
            vmem_limit_bytes=48 * 1024 * 1024),
        cost_estimate=cost,
    )(x, *param_arrays)

    return out[0]   # (B,) == torch.flatten


def init_params(key):
    """PyTorch-like Linear init: W (out,in), b (out,), U(-1/sqrt(fan_in), 1/sqrt(fan_in))."""
    dims = [(100, 50), (50, 25), (25, 5), (5, 1)]
    params = []
    for fan_in, fan_out in dims:
        key, kw, kb = jax.random.split(key, 3)
        bound = 1.0 / math.sqrt(fan_in)
        w = jax.random.uniform(kw, (fan_out, fan_in), jnp.float32, -bound, bound)
        b = jax.random.uniform(kb, (fan_out,), jnp.float32, -bound, bound)
        params.append((w, b))
    return params


def reference_forward(x, params, *, approximate_gelu=True):
    """Pure-JAX reference mirroring the kernel's dtype path (bf16 operands/activations,
    f32 accumulation)."""
    (w1, b1), (w2, b2), (w3, b3), (w4, b4) = params
    gelu = _gelu_tanh if approximate_gelu else _gelu_erf
    xb = x.astype(jnp.bfloat16)
    h = jax.lax.dot_general(w1.astype(jnp.bfloat16), xb, (((1,), (1,)), ((), ())),
                            preferred_element_type=jnp.float32)
    h = gelu((h + b1.reshape(-1, 1)).astype(jnp.bfloat16))
    h = jnp.dot(w2.astype(jnp.bfloat16), h, preferred_element_type=jnp.float32)
    h = gelu((h + b2.reshape(-1, 1)).astype(jnp.bfloat16))
    h = jnp.dot(w3.astype(jnp.bfloat16), h, preferred_element_type=jnp.float32)
    h = gelu((h + b3.reshape(-1, 1)).astype(jnp.bfloat16))
    logits = jnp.sum(w4.reshape(-1, 1) * h.astype(jnp.float32), axis=0) + b4
    return jax.nn.sigmoid(logits).reshape(-1)


if __name__ == "__main__":
    key = jax.random.PRNGKey(0)
    key, kx = jax.random.split(key)
    params = init_params(key)

    # Small, single (partial) tile case.
    B = 8
    x = jax.random.normal(kx, (B, 100), jnp.float32)
    out = jax.block_until_ready(fc_discriminator(x, params))
    ref = reference_forward(x, params)
    assert out.shape == (B,), out.shape
    assert bool(jnp.all(jnp.isfinite(out)))
    assert jnp.allclose(out, ref, atol=5e-3), (out, ref)

    # Multi-tile ragged case: exercises the cdiv grid, partial last block and
    # the direct (1, B) output (no padding anywhere).
    key, kx2 = jax.random.split(key)
    B2 = 300
    x2 = jax.random.normal(kx2, (B2, 100), jnp.float32)
    out2 = jax.block_until_ready(fc_discriminator(x2, params, tile_b=128))
    ref2 = reference_forward(x2, params)
    assert out2.shape == (B2,), out2.shape
    assert jnp.allclose(out2, ref2, atol=5e-3), float(jnp.max(jnp.abs(out2 - ref2)))

    # Exact-erf GELU path (torch parity mode).
    out3 = jax.block_until_ready(fc_discriminator(x, params, approximate_gelu=False))
    ref3 = reference_forward(x, params, approximate_gelu=False)
    assert jnp.allclose(out3, ref3, atol=5e-3), (out3, ref3)

    print("KERNEL_OK")
</pallas_src>

<mosaic_0001>
module attributes {stable_mosaic.version = 11 : i64} {
  func.func @fc_discriminator_kernel(%arg0: i32, %arg1: memref<128x100xf32, #tpu.memory_space<vmem>>, %arg2: memref<50x100xbf16, #tpu.memory_space<vmem>>, %arg3: memref<50x1xf32, #tpu.memory_space<vmem>>, %arg4: memref<25x50xbf16, #tpu.memory_space<vmem>>, %arg5: memref<25x1xf32, #tpu.memory_space<vmem>>, %arg6: memref<5x25xbf16, #tpu.memory_space<vmem>>, %arg7: memref<5x1xf32, #tpu.memory_space<vmem>>, %arg8: memref<5x1xf32, #tpu.memory_space<vmem>>, %arg9: memref<1x1xf32, #tpu.memory_space<vmem>>, %arg10: memref<1x128xf32, #tpu.memory_space<vmem>>) attributes {dimension_semantics = [#tpu.dimension_semantics<parallel>], iteration_bounds = array<i64: 1>, scalar_prefetch = 0 : i64, scratch_operands = 0 : i64, tpu.core_type = #tpu.core_type<tc>, window_params = [{transform_indices = @transform_0, window_bounds = array<i64: 128, 100>}, {pipeline_mode = #tpu.pipeline_mode<synchronous>, transform_indices = @transform_1, window_bounds = array<i64: 50, 100>}, {pipeline_mode = #tpu.pipeline_mode<synchronous>, transform_indices = @transform_2, window_bounds = array<i64: 50, 1>}, {pipeline_mode = #tpu.pipeline_mode<synchronous>, transform_indices = @transform_3, window_bounds = array<i64: 25, 50>}, {pipeline_mode = #tpu.pipeline_mode<synchronous>, transform_indices = @transform_4, window_bounds = array<i64: 25, 1>}, {pipeline_mode = #tpu.pipeline_mode<synchronous>, transform_indices = @transform_5, window_bounds = array<i64: 5, 25>}, {pipeline_mode = #tpu.pipeline_mode<synchronous>, transform_indices = @transform_6, window_bounds = array<i64: 5, 1>}, {pipeline_mode = #tpu.pipeline_mode<synchronous>, transform_indices = @transform_7, window_bounds = array<i64: 5, 1>}, {pipeline_mode = #tpu.pipeline_mode<synchronous>, transform_indices = @transform_8, window_bounds = array<i64: 1, 1>}, {transform_indices = @transform_9, window_bounds = array<i64: 1, 128>}]} {
    %c0 = arith.constant 0 : index
    %c0_0 = arith.constant 0 : index
    %0 = vector.load %arg1[%c0, %c0_0] : memref<128x100xf32, #tpu.memory_space<vmem>>, vector<128x100xf32>
    %1 = arith.truncf %0 : vector<128x100xf32> to vector<128x100xbf16>
    %c0_1 = arith.constant 0 : index
    %c0_2 = arith.constant 0 : index
    %2 = vector.load %arg2[%c0_1, %c0_2] : memref<50x100xbf16, #tpu.memory_space<vmem>>, vector<50x100xbf16>
    %cst = arith.constant dense<0.000000e+00> : vector<50x128xf32>
    %3 = tpu.matmul %2, %1, %cst {dimension_numbers = #tpu.dot_dimension_numbers<[1], [1], [0], [0], [0, 0, 1, 0], [], []>} : vector<50x100xbf16>, vector<128x100xbf16>, vector<50x128xf32> -> vector<50x128xf32>
    %c0_3 = arith.constant 0 : index
    %c0_4 = arith.constant 0 : index
    %4 = vector.load %arg3[%c0_3, %c0_4] : memref<50x1xf32, #tpu.memory_space<vmem>>, vector<50x1xf32>
    %5 = vector.broadcast %4 : vector<50x1xf32> to vector<50x128xf32>
    %6 = arith.addf %3, %5 : vector<50x128xf32>
    %7 = arith.truncf %6 : vector<50x128xf32> to vector<50x128xbf16>
    %8 = arith.mulf %7, %7 : vector<50x128xbf16>
    %9 = arith.mulf %8, %7 : vector<50x128xbf16>
    %cst_5 = arith.constant 4.467770e-02 : bf16
    %10 = vector.broadcast %cst_5 : bf16 to vector<50x128xbf16>
    %11 = arith.mulf %10, %9 : vector<50x128xbf16>
    %12 = arith.addf %7, %11 : vector<50x128xbf16>
    %cst_6 = arith.constant 7.968750e-01 : bf16
    %13 = vector.broadcast %cst_6 : bf16 to vector<50x128xbf16>
    %14 = arith.mulf %13, %12 : vector<50x128xbf16>
    %15 = arith.extf %14 : vector<50x128xbf16> to vector<50x128xf32>
    %16 = math.tanh %15 : vector<50x128xf32>
    %17 = arith.truncf %16 : vector<50x128xf32> to vector<50x128xbf16>
    %cst_7 = arith.constant 5.000000e-01 : bf16
    %18 = vector.broadcast %cst_7 : bf16 to vector<50x128xbf16>
    %19 = arith.mulf %18, %7 : vector<50x128xbf16>
    %cst_8 = arith.constant 1.000000e+00 : bf16
    %20 = vector.broadcast %cst_8 : bf16 to vector<50x128xbf16>
    %21 = arith.addf %20, %17 : vector<50x128xbf16>
    %22 = arith.mulf %19, %21 : vector<50x128xbf16>
    %c0_9 = arith.constant 0 : index
    %c0_10 = arith.constant 0 : index
    %23 = vector.load %arg4[%c0_9, %c0_10] : memref<25x50xbf16, #tpu.memory_space<vmem>>, vector<25x50xbf16>
    %cst_11 = arith.constant dense<0.000000e+00> : vector<25x128xf32>
    %24 = tpu.matmul %23, %22, %cst_11 {dimension_numbers = #tpu.dot_dimension_numbers<[1], [0], [0], [1], [0, 0, 1, 1], [], []>} : vector<25x50xbf16>, vector<50x128xbf16>, vector<25x128xf32> -> vector<25x128xf32>
    %c0_12 = arith.constant 0 : index
    %c0_13 = arith.constant 0 : index
    %25 = vector.load %arg5[%c0_12, %c0_13] : memref<25x1xf32, #tpu.memory_space<vmem>>, vector<25x1xf32>
    %26 = vector.broadcast %25 : vector<25x1xf32> to vector<25x128xf32>
    %27 = arith.addf %24, %26 : vector<25x128xf32>
    %28 = arith.truncf %27 : vector<25x128xf32> to vector<25x128xbf16>
    %29 = arith.mulf %28, %28 : vector<25x128xbf16>
    %30 = arith.mulf %29, %28 : vector<25x128xbf16>
    %cst_14 = arith.constant 4.467770e-02 : bf16
    %31 = vector.broadcast %cst_14 : bf16 to vector<25x128xbf16>
    %32 = arith.mulf %31, %30 : vector<25x128xbf16>
    %33 = arith.addf %28, %32 : vector<25x128xbf16>
    %cst_15 = arith.constant 7.968750e-01 : bf16
    %34 = vector.broadcast %cst_15 : bf16 to vector<25x128xbf16>
    %35 = arith.mulf %34, %33 : vector<25x128xbf16>
    %36 = arith.extf %35 : vector<25x128xbf16> to vector<25x128xf32>
    %37 = math.tanh %36 : vector<25x128xf32>
    %38 = arith.truncf %37 : vector<25x128xf32> to vector<25x128xbf16>
    %cst_16 = arith.constant 5.000000e-01 : bf16
    %39 = vector.broadcast %cst_16 : bf16 to vector<25x128xbf16>
    %40 = arith.mulf %39, %28 : vector<25x128xbf16>
    %cst_17 = arith.constant 1.000000e+00 : bf16
    %41 = vector.broadcast %cst_17 : bf16 to vector<25x128xbf16>
    %42 = arith.addf %41, %38 : vector<25x128xbf16>
    %43 = arith.mulf %40, %42 : vector<25x128xbf16>
    %c0_18 = arith.constant 0 : index
    %c0_19 = arith.constant 0 : index
    %44 = vector.load %arg6[%c0_18, %c0_19] : memref<5x25xbf16, #tpu.memory_space<vmem>>, vector<5x25xbf16>
    %cst_20 = arith.constant dense<0.000000e+00> : vector<5x128xf32>
    %45 = tpu.matmul %44, %43, %cst_20 {dimension_numbers = #tpu.dot_dimension_numbers<[1], [0], [0], [1], [0, 0, 1, 1], [], []>} : vector<5x25xbf16>, vector<25x128xbf16>, vector<5x128xf32> -> vector<5x128xf32>
    %c0_21 = arith.constant 0 : index
    %c0_22 = arith.constant 0 : index
    %46 = vector.load %arg7[%c0_21, %c0_22] : memref<5x1xf32, #tpu.memory_space<vmem>>, vector<5x1xf32>
    %47 = vector.broadcast %46 : vector<5x1xf32> to vector<5x128xf32>
    %48 = arith.addf %45, %47 : vector<5x128xf32>
    %49 = arith.truncf %48 : vector<5x128xf32> to vector<5x128xbf16>
    %50 = arith.mulf %49, %49 : vector<5x128xbf16>
    %51 = arith.mulf %50, %49 : vector<5x128xbf16>
    %cst_23 = arith.constant 4.467770e-02 : bf16
    %52 = vector.broadcast %cst_23 : bf16 to vector<5x128xbf16>
    %53 = arith.mulf %52, %51 : vector<5x128xbf16>
    %54 = arith.addf %49, %53 : vector<5x128xbf16>
    %cst_24 = arith.constant 7.968750e-01 : bf16
    %55 = vector.broadcast %cst_24 : bf16 to vector<5x128xbf16>
    %56 = arith.mulf %55, %54 : vector<5x128xbf16>
    %57 = arith.extf %56 : vector<5x128xbf16> to vector<5x128xf32>
    %58 = math.tanh %57 : vector<5x128xf32>
    %59 = arith.truncf %58 : vector<5x128xf32> to vector<5x128xbf16>
    %cst_25 = arith.constant 5.000000e-01 : bf16
    %60 = vector.broadcast %cst_25 : bf16 to vector<5x128xbf16>
    %61 = arith.mulf %60, %49 : vector<5x128xbf16>
    %cst_26 = arith.constant 1.000000e+00 : bf16
    %62 = vector.broadcast %cst_26 : bf16 to vector<5x128xbf16>
    %63 = arith.addf %62, %59 : vector<5x128xbf16>
    %64 = arith.mulf %61, %63 : vector<5x128xbf16>
    %c0_27 = arith.constant 0 : index
    %c0_28 = arith.constant 0 : index
    %65 = vector.load %arg8[%c0_27, %c0_28] : memref<5x1xf32, #tpu.memory_space<vmem>>, vector<5x1xf32>
    %66 = arith.extf %64 : vector<5x128xbf16> to vector<5x128xf32>
    %67 = vector.broadcast %65 : vector<5x1xf32> to vector<5x128xf32>
    %68 = arith.mulf %67, %66 : vector<5x128xf32>
    %cst_29 = arith.constant dense<0.000000e+00> : vector<128xf32>
    %69 = vector.multi_reduction <add>, %68, %cst_29 [0] : vector<5x128xf32> to vector<128xf32>
    %70 = vector.shape_cast %69 : vector<128xf32> to vector<1x128xf32>
    %c0_30 = arith.constant 0 : index
    %c0_31 = arith.constant 0 : index
    %71 = vector.load %arg9[%c0_30, %c0_31] : memref<1x1xf32, #tpu.memory_space<vmem>>, vector<1x1xf32>
    %72 = vector.broadcast %71 : vector<1x1xf32> to vector<1x128xf32>
    %73 = arith.addf %70, %72 : vector<1x128xf32>
    %74 = arith.negf %73 : vector<1x128xf32>
    %75 = math.exp %74 : vector<1x128xf32>
    %cst_32 = arith.constant 1.000000e+00 : f32
    %76 = vector.broadcast %cst_32 : f32 to vector<1x128xf32>
    %77 = arith.addf %76, %75 : vector<1x128xf32>
    %78 = arith.divf %76, %77 : vector<1x128xf32>
    %c0_33 = arith.constant 0 : index
    %c0_34 = arith.constant 0 : index
    %79 = vector.load %arg10[%c0_33, %c0_34] : memref<1x128xf32, #tpu.memory_space<vmem>>, vector<1x128xf32>
    tpu.vector_store %arg10[%c0_33, %c0_34], %78 {strides = array<i32>} : memref<1x128xf32, #tpu.memory_space<vmem>>, vector<1x128xf32>,
    return
  }
  func.func @transform_0(%arg0: i32) -> (i32, i32) {
    %c0_i32 = arith.constant 0 : i32
    %c0_i32_0 = arith.constant 0 : i32
    return %arg0, %c0_i32 : i32, i32
  }
  func.func @transform_1(%arg0: i32) -> (i32, i32) {
    %c0_i32 = arith.constant 0 : i32
    %c0_i32_0 = arith.constant 0 : i32
    %c0_i32_1 = arith.constant 0 : i32
    return %c0_i32, %c0_i32_0 : i32, i32
  }
  func.func @transform_2(%arg0: i32) -> (i32, i32) {
    %c0_i32 = arith.constant 0 : i32
    %c0_i32_0 = arith.constant 0 : i32
    %c0_i32_1 = arith.constant 0 : i32
    return %c0_i32, %c0_i32_0 : i32, i32
  }
  func.func @transform_3(%arg0: i32) -> (i32, i32) {
    %c0_i32 = arith.constant 0 : i32
    %c0_i32_0 = arith.constant 0 : i32
    %c0_i32_1 = arith.constant 0 : i32
    return %c0_i32, %c0_i32_0 : i32, i32
  }
  func.func @transform_4(%arg0: i32) -> (i32, i32) {
    %c0_i32 = arith.constant 0 : i32
    %c0_i32_0 = arith.constant 0 : i32
    %c0_i32_1 = arith.constant 0 : i32
    return %c0_i32, %c0_i32_0 : i32, i32
  }
  func.func @transform_5(%arg0: i32) -> (i32, i32) {
    %c0_i32 = arith.constant 0 : i32
    %c0_i32_0 = arith.constant 0 : i32
    %c0_i32_1 = arith.constant 0 : i32
    return %c0_i32, %c0_i32_0 : i32, i32
  }
  func.func @transform_6(%arg0: i32) -> (i32, i32) {
    %c0_i32 = arith.constant 0 : i32
    %c0_i32_0 = arith.constant 0 : i32
    %c0_i32_1 = arith.constant 0 : i32
    return %c0_i32, %c0_i32_0 : i32, i32
  }
  func.func @transform_7(%arg0: i32) -> (i32, i32) {
    %c0_i32 = arith.constant 0 : i32
    %c0_i32_0 = arith.constant 0 : i32
    %c0_i32_1 = arith.constant 0 : i32
    return %c0_i32, %c0_i32_0 : i32, i32
  }
  func.func @transform_8(%arg0: i32) -> (i32, i32) {
    %c0_i32 = arith.constant 0 : i32
    %c0_i32_0 = arith.constant 0 : i32
    %c0_i32_1 = arith.constant 0 : i32
    return %c0_i32, %c0_i32_0 : i32, i32
  }
  func.func @transform_9(%arg0: i32) -> (i32, i32) {
    %c0_i32 = arith.constant 0 : i32
    %c0_i32_0 = arith.constant 0 : i32
    return %c0_i32, %arg0 : i32, i32
  }
}

</mosaic_0001>

<bundles_post_ra>
// kernel: tpu_custom_call.1
= control target key start
LH: loop header
LB: loop body
LE: loop exit
PB: predicated region body
PF: predicated region fallthrough
CT: control target
= control target key end

     0   :  { %s1039_s0 = inlined_call_operand.vmem [shape: f32[8,100], index: 0, kind: input, shape index: {}]   ;;  %s1040_s1 = inlined_call_operand.vmem [shape: bf16[50,100], index: 1, kind: input, shape index: {}]   ;;  %s1041_s2 = inlined_call_operand.vmem [shape: f32[50,1], index: 2, kind: input, shape index: {}]   ;;  %s1042_s3 = inlined_call_operand.vmem [shape: bf16[25,50], index: 3, kind: input, shape index: {}]   ;;  %s1043_s4 = inlined_call_operand.vmem [shape: f32[25,1], index: 4, kind: input, shape index: {}]   ;;  %s1044_s5 = inlined_call_operand.vmem [shape: bf16[5,25], index: 5, kind: input, shape index: {}]   ;;  %s1045_s6 = inlined_call_operand.vmem [shape: f32[5,1], index: 6, kind: input, shape index: {}]   ;;  %s1046_s7 = inlined_call_operand.vmem [shape: f32[5,1], index: 7, kind: input, shape index: {}]   ;;  %s1047_s8 = inlined_call_operand.<no memory space> [shape: f32[1,1], index: 8, kind: input, shape index: {}]   ;;  %s1048_s9 = inlined_call_operand.hbm [shape: f32[1,8], index: 9, kind: output, shape index: {}]  }
   0x1   :  { %v14_v0 = vstv %s1047_s8 }
   0x2   :  { %15 = vst [vmem:[#allocation2] sm:$0x1] %v14_v0 }
   0x3   :  { %v50_v1 = vld [vmem:[%s1039_s0 + $0x70] sm:$0xff]  ;;  %v51_v2 = vld [vmem:[%s1039_s0 + $0x78] sm:$0xff]  ;;  %vm127_vm0 = vcmask 818176   ;;  %v48_v4 = vld [vmem:[%s1039_s0 + $0x60] sm:$0xff] }
   0x4   :  { %v59_v3 = vpack.c.bf16 %v51_v2, %v50_v1  ;;  %v49_v5 = vld [vmem:[%s1039_s0 + $0x68] sm:$0xff] }
   0x6   :  { %v162_v6 = vsel %vm127_vm0, %v59_v3, 0 }
   0x7   :  { %16 = vsyncpa [#allocation4], 0  ;;  %164 = vmatpush.bf16.xpose.msra.mxu0 %v162_v6  ;;  %714 = vmatpush.bf16.xpose.msra.mxu3 %v162_v6  ;;  %v58_v7 = vpack.c.bf16 %v49_v5, %v48_v4  ;;  %v46_v9 = vld [vmem:[%s1039_s0 + $0x50] sm:$0xff]  ;;  %v47_v10 = vld [vmem:[%s1039_s0 + $0x58] sm:$0xff]  ;;  %v782_v26 = vmov 0   ;;  %vm430_vm1 = vcmask 1040384  }
   0x8   :  { %v57_v11 = vpack.c.bf16 %v47_v10, %v46_v9  ;;  %v44_v13 = vld [vmem:[%s1039_s0 + $0x40] sm:$0xff]  ;;  %v45_v14 = vld [vmem:[%s1039_s0 + $0x48] sm:$0xff]  ;;  %v42_v17 = vld [vmem:[%s1039_s0 + $0x30] sm:$0xff]  ;;  %725 = vset.pattern.permute.xlu0 %v782_v26  ;;  %726 = vset.pattern.permute.xlu1 %v782_v26  ;;  %vm423_vm2 = vcmask 408576   ;;  %vm574_vm3 = vcmask 1043456   ;;  %vm575_vm4 = vcmask 1044480  }
   0x9   :  { %v159_v8 = vsel %vm127_vm0, %v58_v7, 0  ;;  %v56_v15 = vpack.c.bf16 %v45_v14, %v44_v13  ;;  %v43_v18 = vld [vmem:[%s1039_s0 + $0x38] sm:$0xff]  ;;  %v40_v21 = vld [vmem:[%s1039_s0 + $0x20] sm:$0xff]  ;;  %v41_v22 = vld [vmem:[%s1039_s0 + $0x28] sm:$0xff]  ;;  %727 = vset.pattern.permute.xlu2 %v782_v26  ;;  %vm570_vm5 = vcmask 203776   ;;  %s672_s14 = sshll.u32 %s1048_s9, 4  ;;  %s673_s14 = int_to_ptr.hbm [resolvable:$true] %s672_s14 }
   0xa   :  { %v156_v12 = vsel %vm127_vm0, %v57_v11, 0  ;;  %v55_v19 = vpack.c.bf16 %v43_v18, %v42_v17  ;;  %v73_v23 = vld [vmem:[%s1041_s2 + $0x30] sm:$0x3]  ;;  %v72_v24 = vld [vmem:[%s1041_s2 + $0x28] sm:$0xff]  ;;  %v54_v25 = vpack.c.bf16 %v41_v22, %v40_v21  ;;  %v39_v29 = vld [vmem:[%s1039_s0 + $0x18] sm:$0xff] }
   0xb   :  { %v153_v16 = vsel %vm127_vm0, %v56_v15, 0  ;;  %106 = vperm.xlu0 %725, %v73_v23   ;;  %101 = vperm.xlu1 %726, %v72_v24   ;;  %v38_v28 = vld [vmem:[%s1039_s0 + $0x10] sm:$0xff]  ;;  %v71_v30 = vld [vmem:[%s1041_s2 + $0x20] sm:$0xff]  ;;  %v37_v34 = vld [vmem:[%s1039_s0 + $0x8] sm:$0xff] }
   0xc   :  { %v150_v20 = vsel %vm127_vm0, %v55_v19, 0  ;;  %v147_v27 = vsel %vm127_vm0, %v54_v25, 0  ;;  %v53_v31 = vpack.c.bf16 %v39_v29, %v38_v28  ;;  %v36_v33 = vld [vmem:[%s1039_s0] sm:$0xff]  ;;  %v69_v35 = vld [vmem:[%s1041_s2 + $0x10] sm:$0xff]  ;;  %v68_v36 = vld [vmem:[%s1041_s2 + $0x8] sm:$0xff] }
   0xd   :  { %v70_v37 = vld [vmem:[%s1041_s2 + $0x18] sm:$0xff]  ;;  %v52_v38 = vpack.c.bf16 %v37_v34, %v36_v33  ;;  %v709_v40 = vld [vmem:[%s1040_s1] sm:$0xff]  ;;  %v710_v41 = vld [vmem:[%s1040_s1 + $0x8] sm:$0xff] }
   0xe   :  { %v144_v32 = vsel %vm127_vm0, %v53_v31, 0  ;;  %91 = vperm.xlu2 %727, %v70_v37   ;;  %v391_v42 = vld [vmem:[%s1043_s4 + $0x10] sm:$0xff]  ;;  %v67_v43 = vld [vmem:[%s1041_s2] sm:$0xff]  ;;  %v390_v45 = vld [vmem:[%s1043_s4 + $0x8] sm:$0xff] }
   0xf   :  { %165 = vmatpush.bf16.xpose.msra.mxu0 %v159_v8  ;;  %715 = vmatpush.bf16.xpose.msra.mxu3 %v159_v8  ;;  %v141_v39 = vsel %vm127_vm0, %v52_v38, 0  ;;  %v389_v44 = vld [vmem:[%s1043_s4] sm:$0xff]  ;;  %v392_v46 = vld [vmem:[%s1043_s4 + $0x18] sm:$0x1]  ;;  %v711_v48 = vld [vmem:[%s1040_s1 + $0x10] sm:$0xff] }
  0x10   :  { %v622_v47 = vld [vmem:[%s1046_s7] sm:$0x1f]  ;;  %v66_v51 = vld [vmem:[%s1040_s1 + $0x18] sm:$0x1] }
  0x11   :  { %v637_v49 = vld [vmem:[#allocation2] sm:$0x1]  ;;  %v122_v52 = vunpack.c.l.b16 %v66_v51 }
  0x12   :  { %v564_v50 = vld [vmem:[%s1045_s6] sm:$0x1f] }
  0x13   :  { %96 = vperm.xlu0 %725, %v71_v30   ;;  %86 = vperm.xlu1 %726, %v69_v35   ;;  %v126_v53 = vpack.c.b16 %v122_v52, %v122_v52 }
  0x16   :  { %76 = vperm.xlu2 %727, %v67_v43  }
  0x17   :  { %166 = vmatpush.bf16.xpose.msra.mxu0 %v156_v12  ;;  %716 = vmatpush.bf16.xpose.msra.mxu3 %v156_v12 }
  0x1b   :  { %81 = vperm.xlu0 %725, %v68_v36   ;;  %405 = vperm.xlu1 %726, %v391_v42  }
  0x1e   :  { %410 = vperm.xlu2 %727, %v392_v46  }
  0x1f   :  { %167 = vmatpush.bf16.xpose.msra.mxu0 %v153_v16  ;;  %717 = vmatpush.bf16.xpose.msra.mxu3 %v153_v16 }
  0x23   :  { %395 = vperm.xlu0 %725, %v389_v44   ;;  %400 = vperm.xlu1 %726, %v390_v45  }
  0x26   :  { %567 = vperm.xlu2 %727, %v564_v50  }
  0x27   :  { %168 = vmatpush.bf16.xpose.msra.mxu0 %v150_v20  ;;  %718 = vmatpush.bf16.xpose.msra.mxu3 %v150_v20 }
  0x2b   :  { %626 = vperm.xlu0 %725, %v622_v47   ;;  %640 = vperm.xlu1 %726, %v637_v49  }
  0x2f   :  { %169 = vmatpush.bf16.xpose.msra.mxu0 %v147_v27  ;;  %719 = vmatpush.bf16.xpose.msra.mxu3 %v147_v27 }
  0x37   :  { %170 = vmatpush.bf16.xpose.msra.mxu0 %v144_v32  ;;  %720 = vmatpush.bf16.xpose.msra.mxu3 %v144_v32 }
  0x3f   :  { %171 = vmatpush.bf16.xpose.msra.mxu0 %v141_v39  ;;  %721 = vmatpush.bf16.xpose.msra.mxu3 %v141_v39 }
  0x46   :  { %693 = vmatmul.msk.bf16.vlgmr.msra.gmra.mxu0 %vm127_vm0, %v709_v40  ;;  %694 = vmatmul.msk.bf16.vlgmr.msra.gmra.mxu3 %vm127_vm0, %v710_v41 }
  0x56   :  { %695 = vmatmul.msk.bf16.gmra.mxu3 %vm127_vm0, %v711_v48 }
  0x66   :  { %696 = vmatmul.msk.bf16.gmra.mxu3 %vm127_vm0, %v126_v53 }
  0x68   :  { %v92_v55 = vpop.permute.xlu2 %91 }
  0x70   :  { %v77_v59 = vpop.permute.xlu2 %76 }
  0x7d   :  { %v949_v54 = vpop.permute.xlu0 %106  ;;  %v102_v56 = vpop.permute.xlu1 %101 }
  0x85   :  { %v97_v57 = vpop.permute.xlu0 %96  ;;  %v87_v61 = vpop.permute.xlu1 %86 }
  0x8d   :  { %v82_v63 = vpop.permute.xlu0 %81 }
  0xc3   :  { %v173_v58 = vpop.f32.mrf.mxu0 }
  0xc4   :  { %v174_v60 = vadd.f32 %v173_v58, %v77_v59 }
  0xc6   :  { %v192_v1 = vpack.c.bf16 %v174_v60, %v174_v60 }
  0xc8   :  { %v953_v7 = vunpack.c.l.bf16 %v192_v1 }
  0xc9   :  { %v178_v62 = vpop.f32.mrf.mxu3 }
  0xca   :  { %v179_v0 = vadd.f32 %v178_v62, %v87_v61  ;;  %v206_v13 = vmul.f32 %v953_v7, %v953_v7 }
  0xcb   :  { %v175_v2 = vpop.f32.mrf.mxu0 }
  0xcc   :  { %v194_v3 = vpack.c.bf16 %v179_v0, %v179_v0  ;;  %v176_v4 = vadd.f32 %v175_v2, %v82_v63  ;;  %v213_v18 = vpack.c.bf16 %v206_v13, %v206_v13 }
  0xce   :  { %v951_v5 = vunpack.c.l.bf16 %v194_v3  ;;  %v193_v6 = vpack.c.bf16 %v176_v4, %v176_v4  ;;  %v220_v24 = vunpack.c.l.bf16 %v213_v18 }
  0xd0   :  { %v208_v8 = vmul.f32 %v951_v5, %v951_v5  ;;  %v957_v9 = vunpack.c.l.bf16 %v193_v6  ;;  %v227_v31 = vmul.f32 %v220_v24, %v953_v7 }
  0xd1   :  { %v180_v10 = vpop.f32.mrf.mxu3 }
  0xd2   :  { %v207_v11 = vmul.f32 %v957_v9, %v957_v9  ;;  %v181_v12 = vadd.f32 %v180_v10, %v92_v55  ;;  %v215_v14 = vpack.c.bf16 %v208_v8, %v208_v8  ;;  %v234_v40 = vpack.c.bf16 %v227_v31, %v227_v31 }
  0xd4   :  { %v195_v15 = vpack.c.bf16 %v181_v12, %v181_v12  ;;  %v214_v16 = vpack.c.bf16 %v207_v11, %v207_v11  ;;  %v222_v19 = vunpack.c.l.bf16 %v215_v14  ;;  %v241_v48 = vunpack.c.l.bf16 %v234_v40 }
  0xd6   :  { %v963_v17 = vunpack.c.l.bf16 %v195_v15  ;;  %v221_v21 = vunpack.c.l.bf16 %v214_v16  ;;  %v229_v25 = vmul.f32 %v222_v19, %v951_v5  ;;  %v248_v59 = vmul.f32 0.044677734, %v241_v48 }
  0xd8   :  { %v209_v20 = vmul.f32 %v963_v17, %v963_v17  ;;  %v228_v28 = vmul.f32 %v221_v21, %v957_v9  ;;  %v236_v32 = vpack.c.bf16 %v229_v25, %v229_v25  ;;  %v255_v6 = vpack.c.bf16 %v248_v59, %v248_v59 }
  0xd9   :  { %v183_v22 = vpop.f32.mrf.mxu3 }
  0xda   :  { %v216_v23 = vpack.c.bf16 %v209_v20, %v209_v20  ;;  %v184_v26 = vadd.f32 %v183_v22, %v97_v57  ;;  %v235_v35 = vpack.c.bf16 %v228_v28, %v228_v28  ;;  %v243_v41 = vunpack.c.l.bf16 %v236_v32 }
  0xdb   :  { %v262_v19 = vunpack.c.l.bf16 %v255_v6 }
  0xdc   :  { %v223_v27 = vunpack.c.l.bf16 %v216_v23  ;;  %v196_v29 = vpack.c.bf16 %v184_v26, %v184_v26  ;;  %v242_v44 = vunpack.c.l.bf16 %v235_v35  ;;  %v250_v49 = vmul.f32 0.044677734, %v243_v41 }
  0xde   :  { %v230_v30 = vmul.f32 %v223_v27, %v963_v17  ;;  %v971_v33 = vunpack.c.l.bf16 %v196_v29  ;;  %v249_v52 = vmul.f32 0.044677734, %v242_v44  ;;  %v257_v60 = vpack.c.bf16 %v250_v49, %v250_v49 }
  0xdf   :  { %v269_v29 = vadd.f32 %v262_v19, %v953_v7 }
  0xe0   :  { %v237_v34 = vpack.c.bf16 %v230_v30, %v230_v30  ;;  %v210_v36 = vmul.f32 %v971_v33, %v971_v33  ;;  %v256_v0 = vpack.c.bf16 %v249_v52, %v249_v52  ;;  %v264_v8 = vunpack.c.l.bf16 %v257_v60 }
  0xe1   :  { %v185_v37 = vpop.f32.mrf.mxu3 }
  0xe2   :  { %v244_v38 = vunpack.c.l.bf16 %v237_v34  ;;  %v186_v39 = vadd.f32 %v185_v37, %v102_v56  ;;  %v217_v42 = vpack.c.bf16 %v210_v36, %v210_v36  ;;  %v271_v20 = vadd.f32 %v264_v8, %v951_v5 }
  0xe4   :  { %v197_v43 = vpack.c.bf16 %v186_v39, %v186_v39  ;;  %v251_v45 = vmul.f32 0.044677734, %v244_v38  ;;  %v224_v46 = vunpack.c.l.bf16 %v217_v42  ;;  %v278_v30 = vpack.c.bf16 %v271_v20, %v271_v20 }
  0xe5   :  { %v276_v39 = vpack.c.bf16 %v269_v29, %v269_v29 }
  0xe6   :  { %v975_v47 = vunpack.c.l.bf16 %v197_v43  ;;  %v231_v50 = vmul.f32 %v224_v46, %v971_v33  ;;  %v258_v53 = vpack.c.bf16 %v251_v45, %v251_v45  ;;  %v285_v40 = vunpack.c.l.bf16 %v278_v30 }
  0xe7   :  { %v283_v49 = vunpack.c.l.bf16 %v276_v39 }
  0xe8   :  { %v211_v51 = vmul.f32 %v975_v47, %v975_v47  ;;  %v238_v55 = vpack.c.bf16 %v231_v50, %v231_v50  ;;  %v265_v1 = vunpack.c.l.bf16 %v258_v53 }
  0xe9   :  { %v188_v56 = vpop.f32.mrf.mxu3 }
  0xea   :  { %v218_v57 = vpack.c.bf16 %v211_v51, %v211_v51  ;;  %v189_v58 = vadd.f32 %v188_v56, %v949_v54  ;;  %v245_v61 = vunpack.c.l.bf16 %v238_v55  ;;  %v263_v54 = vunpack.c.l.bf16 %v256_v0 }
  0xeb   :  { %v272_v13 = vadd.f32 %v265_v1, %v963_v17  ;;  %v292_v51 = vmul.f32 0.796875, %v285_v40  ;;  %v329_v40 = vmul.f32 0.5, %v971_v33 }
  0xec   :  { %v225_v62 = vunpack.c.l.bf16 %v218_v57  ;;  %v198_v63 = vpack.c.bf16 %v189_v58, %v189_v58  ;;  %v252_v2 = vmul.f32 0.044677734, %v245_v61  ;;  %v270_v24 = vadd.f32 %v263_v54, %v957_v9 }
  0xed   :  { %v279_v25 = vpack.c.bf16 %v272_v13, %v272_v13  ;;  %v299_v60 = vpack.c.bf16 %v292_v51, %v292_v51  ;;  %v290_v61 = vmul.f32 0.796875, %v283_v49 }
  0xee   :  { %v232_v3 = vmul.f32 %v225_v62, %v975_v47  ;;  %v982_v4 = vunpack.c.l.bf16 %v198_v63  ;;  %v259_v10 = vpack.c.bf16 %v252_v2, %v252_v2  ;;  %v277_v35 = vpack.c.bf16 %v270_v24, %v270_v24 }
  0xef   :  { %v286_v36 = vunpack.c.l.bf16 %v279_v25  ;;  %v297_v6 = vpack.c.bf16 %v290_v61, %v290_v61 }
  0xf0   :  { %v239_v11 = vpack.c.bf16 %v232_v3, %v232_v3  ;;  %v212_v12 = vmul.f32 %v982_v4, %v982_v4  ;;  %v266_v14 = vunpack.c.l.bf16 %v259_v10  ;;  %v284_v44 = vunpack.c.l.bf16 %v277_v35 }
  0xf1   :  { %v190_v15 = vpop.f32.mrf.mxu3  ;;  %v293_v45 = vmul.f32 0.796875, %v286_v36  ;;  %v306_v3 = vunpack.c.l.bf16 %v299_v60  ;;  %v325_v60 = vmul.f32 0.5, %v953_v7 }
  0xf2   :  { %v246_v16 = vunpack.c.l.bf16 %v239_v11  ;;  %v219_v18 = vpack.c.bf16 %v212_v12, %v212_v12  ;;  %v273_v21 = vadd.f32 %v266_v14, %v971_v33  ;;  %v291_v56 = vmul.f32 0.796875, %v284_v44 }
  0xf3   :  { %v300_v55 = vpack.c.bf16 %v293_v45, %v293_v45  ;;  %v304_v12 = vunpack.c.l.bf16 %v297_v6  ;;  %v332_v6 = vpack.c.bf16 %v325_v60, %v325_v60 }
  0xf4   :  { %v253_v22 = vmul.f32 0.044677734, %v246_v16  ;;  %v226_v23 = vunpack.c.l.bf16 %v219_v18  ;;  %v280_v26 = vpack.c.bf16 %v273_v21, %v273_v21  ;;  %v298_v1 = vpack.c.bf16 %v291_v56, %v291_v56 }
  0xf5   :  { %v307_v0 = vunpack.c.l.bf16 %v300_v55 }
  0xf6   :  { %v260_v27 = vpack.c.bf16 %v253_v22, %v253_v22  ;;  %v233_v28 = vmul.f32 %v226_v23, %v982_v4  ;;  %v287_v31 = vunpack.c.l.bf16 %v280_v26  ;;  %v305_v10 = vunpack.c.l.bf16 %v298_v1 }
  0xf8   :  { %v267_v32 = vunpack.c.l.bf16 %v260_v27  ;;  %v240_v34 = vpack.c.bf16 %v233_v28, %v233_v28  ;;  %v294_v41 = vmul.f32 0.796875, %v287_v31  ;;  %v331_v28 = vmul.f32 0.5, %v982_v4 }
  0xfa   :  { %v274_v37 = vadd.f32 %v267_v32, %v975_v47  ;;  %v247_v38 = vunpack.c.l.bf16 %v240_v34  ;;  %v301_v50 = vpack.c.bf16 %v294_v41, %v294_v41  ;;  %v330_v34 = vmul.f32 0.5, %v975_v47 }
  0xfb   :  { %v327_v47 = vmul.f32 0.5, %v951_v5 }
  0xfc   :  { %v281_v42 = vpack.c.bf16 %v274_v37, %v274_v37  ;;  %v254_v43 = vmul.f32 0.044677734, %v247_v38  ;;  %v308_v59 = vunpack.c.l.bf16 %v301_v50  ;;  %v338_v38 = vpack.c.bf16 %v331_v28, %v331_v28 }
  0xfd   :  { %v337_v45 = vpack.c.bf16 %v330_v34, %v330_v34 }
  0xfe   :  { %v288_v46 = vunpack.c.l.bf16 %v281_v42  ;;  %v261_v48 = vpack.c.bf16 %v254_v43, %v254_v43  ;;  %v366_v50 = vunpack.c.l.bf16 %v338_v38 }
 0x100   :  { %v268_v52 = vunpack.c.l.bf16 %v261_v48  ;;  %v295_v53 = vmul.f32 0.796875, %v288_v46 }
 0x102   :  { %v275_v57 = vadd.f32 %v268_v52, %v982_v4  ;;  %v302_v58 = vpack.c.bf16 %v295_v53, %v295_v53  ;;  %v328_v4 = vmul.f32 0.5, %v963_v17  ;;  %v326_v52 = vmul.f32 0.5, %v957_v9 }
 0x103   :  { %v336_v53 = vpack.c.bf16 %v329_v40, %v329_v40 }
 0x104   :  { %v282_v62 = vpack.c.bf16 %v275_v57, %v275_v57  ;;  %v309_v63 = vunpack.c.l.bf16 %v302_v58  ;;  %v365_v58 = vunpack.c.l.bf16 %v337_v45 }
 0x105   :  { %v364_v1 = vunpack.c.l.bf16 %v336_v53 }
 0x106   :  { %v289_v2 = vunpack.c.l.bf16 %v282_v62  ;;  %728 = vtanh.f32 %v309_v63 }
 0x107   :  { %730 = vtanh.f32 %v308_v59  ;;  %v335_v59 = vpack.c.bf16 %v328_v4, %v328_v4 }
 0x108   :  { %v296_v8 = vmul.f32 0.796875, %v289_v2  ;;  %732 = vtanh.f32 %v307_v0  ;;  %v334_v0 = vpack.c.bf16 %v327_v47, %v327_v47 }
 0x109   :  { %734 = vtanh.f32 %v306_v3 }
 0x10a   :  { %v303_v11 = vpack.c.bf16 %v296_v8, %v296_v8  ;;  %736 = vtanh.f32 %v305_v10  ;;  %v333_v8 = vpack.c.bf16 %v326_v52, %v326_v52  ;;  %v362_v7 = vunpack.c.l.bf16 %v334_v0 }
 0x10c   :  { %v729_v54 = vpop.eup %728  ;;  %v310_v13 = vunpack.c.l.bf16 %v303_v11  ;;  %v363_v11 = vunpack.c.l.bf16 %v335_v59 }
 0x10d   :  { %v731_v14 = vpop.eup %730  ;;  %v323_v15 = vpack.c.bf16 %v729_v54, %v729_v54 }
 0x10e   :  { %738 = vtanh.f32 %v310_v13  ;;  %v733_v16 = vpop.eup %732  ;;  %v322_v18 = vpack.c.bf16 %v731_v14, %v731_v14 }
 0x10f   :  { %740 = vtanh.f32 %v304_v12  ;;  %v735_v19 = vpop.eup %734  ;;  %v344_v20 = vunpack.c.l.bf16 %v323_v15  ;;  %v321_v21 = vpack.c.bf16 %v733_v16, %v733_v16 }
 0x110   :  { %v737_v22 = vpop.eup %736  ;;  %v343_v24 = vunpack.c.l.bf16 %v322_v18  ;;  %v320_v25 = vpack.c.bf16 %v735_v19, %v735_v19  ;;  %v360_v18 = vunpack.c.l.bf16 %v332_v6  ;;  %v361_v19 = vunpack.c.l.bf16 %v333_v8 }
 0x111   :  { %v351_v29 = vadd.f32 1.0, %v344_v20  ;;  %v342_v30 = vunpack.c.l.bf16 %v321_v21  ;;  %v319_v31 = vpack.c.bf16 %v737_v22, %v737_v22 }
 0x112   :  { %v350_v35 = vadd.f32 1.0, %v343_v24  ;;  %v341_v36 = vunpack.c.l.bf16 %v320_v25  ;;  %v712_v25 = vld [vmem:[%s1042_s3] sm:$0xff] }
 0x113   :  { %v358_v41 = vpack.c.bf16 %v351_v29, %v351_v29  ;;  %v349_v42 = vadd.f32 1.0, %v342_v30  ;;  %v340_v43 = vunpack.c.l.bf16 %v319_v31  ;;  %v406_v29 = vpop.permute.xlu1 %405  ;;  %v396_v30 = vpop.permute.xlu0 %395 }
 0x114   :  { %v739_v23 = vpop.eup %738  ;;  %v357_v46 = vpack.c.bf16 %v350_v35, %v350_v35  ;;  %v348_v48 = vadd.f32 1.0, %v341_v36 }
 0x115   :  { %v741_v26 = vpop.eup %740  ;;  %v324_v27 = vpack.c.bf16 %v739_v23, %v739_v23  ;;  %v372_v55 = vunpack.c.l.bf16 %v358_v41  ;;  %v356_v56 = vpack.c.bf16 %v349_v42, %v349_v42  ;;  %v347_v33 = vadd.f32 1.0, %v340_v43 }
 0x116   :  { %v318_v37 = vpack.c.bf16 %v741_v26, %v741_v26  ;;  %v371_v17 = vunpack.c.l.bf16 %v357_v46  ;;  %v355_v61 = vpack.c.bf16 %v348_v48, %v348_v48  ;;  %v703_v26 = vld [vmem:[%s1042_s3 + $0x8] sm:$0xf] }
 0x117   :  { %v345_v32 = vunpack.c.l.bf16 %v324_v27  ;;  %v379_v2 = vmul.f32 %v372_v55, %v365_v58  ;;  %v370_v5 = vunpack.c.l.bf16 %v356_v56  ;;  %v354_v3 = vpack.c.bf16 %v347_v33, %v347_v33  ;;  %v713_v27 = vld [vmem:[%s1042_s3 + $0x8] sm:$0x10]  ;;  %v411_v58 = vpop.permute.xlu2 %410 }
 0x118   :  { %v339_v49 = vunpack.c.l.bf16 %v318_v37  ;;  %v378_v10 = vmul.f32 %v371_v17, %v364_v1  ;;  %v369_v12 = vunpack.c.l.bf16 %v355_v61  ;;  %v704_v28 = vor.u32 %v713_v27, %v703_v26 }
 0x119   :  { %v352_v39 = vadd.f32 1.0, %v345_v32  ;;  %v377_v14 = vmul.f32 %v370_v5, %v363_v11  ;;  %v368_v15 = vunpack.c.l.bf16 %v354_v3 }
 0x11a   :  { %v346_v62 = vadd.f32 1.0, %v339_v49  ;;  %v383_v13 = vpack.c.bf16 %v379_v2, %v378_v10  ;;  %v376_v16 = vmul.f32 %v369_v12, %v362_v7 }
 0x11b   :  { %v359_v44 = vpack.c.bf16 %v352_v39, %v352_v39  ;;  %v375_v22 = vmul.f32 %v368_v15, %v361_v19  ;;  %v401_v37 = vpop.permute.xlu1 %400 }
 0x11c   :  { %v353_v54 = vpack.c.bf16 %v346_v62, %v346_v62  ;;  %v382_v21 = vpack.c.bf16 %v377_v14, %v376_v16 }
 0x11d   :  { %v373_v51 = vunpack.c.l.bf16 %v359_v44 }
 0x11e   :  { %v367_v20 = vunpack.c.l.bf16 %v353_v54 }
 0x11f   :  { %v380_v57 = vmul.f32 %v373_v51, %v366_v50 }
 0x120   :  { %v374_v23 = vmul.f32 %v367_v20, %v360_v18 }
 0x121   :  { %v384_v63 = vpack.c.bf16 %v380_v57, %v380_v57 }
 0x122   :  { %v381_v24 = vpack.c.bf16 %v375_v22, %v374_v23 }
 0x123   :  { %v432_v9 = vsel %vm430_vm1, %v384_v63, 0 }
 0x124   :  { %438 = vmatpush.bf16.msra.mxu1 %v432_v9 }
 0x128   :  { %439 = vmatpush.bf16.msra.mxu1 %v383_v13 }
 0x12c   :  { %440 = vmatpush.bf16.msra.mxu1 %v382_v21 }
 0x130   :  { %441 = vmatpush.bf16.msra.mxu1 %v381_v24 }
 0x133   :  { %705 = vmatmul.msk.bf16.vlgmr.msra.gmra.mxu1 %vm423_vm2, %v712_v25 }
 0x143   :  { %706 = vmatmul.msk.bf16.gmra.mxu1 %vm423_vm2, %v704_v28 }
 0x1b0   :  { %v443_v31 = vpop.f32.mrf.mxu1 }
 0x1b1   :  { %v444_v32 = vadd.f32 %v443_v31, %v396_v30 }
 0x1b3   :  { %v453_v34 = vpack.c.bf16 %v444_v32, %v444_v32 }
 0x1b5   :  { %v1010_v35 = vunpack.c.l.bf16 %v453_v34 }
 0x1b7   :  { %v461_v36 = vmul.f32 %v1010_v35, %v1010_v35 }
 0x1b8   :  { %v445_v38 = vpop.f32.mrf.mxu1 }
 0x1b9   :  { %v465_v39 = vpack.c.bf16 %v461_v36, %v461_v36  ;;  %v446_v40 = vadd.f32 %v445_v38, %v401_v37 }
 0x1bb   :  { %v469_v41 = vunpack.c.l.bf16 %v465_v39  ;;  %v454_v42 = vpack.c.bf16 %v446_v40, %v446_v40 }
 0x1bd   :  { %v473_v43 = vmul.f32 %v469_v41, %v1010_v35  ;;  %v1015_v44 = vunpack.c.l.bf16 %v454_v42 }
 0x1bf   :  { %v477_v45 = vpack.c.bf16 %v473_v43, %v473_v43  ;;  %v462_v4 = vmul.f32 %v1015_v44, %v1015_v44 }
 0x1c0   :  { %v448_v46 = vpop.f32.mrf.mxu1 }
 0x1c1   :  { %v481_v48 = vunpack.c.l.bf16 %v477_v45  ;;  %v466_v49 = vpack.c.bf16 %v462_v4, %v462_v4  ;;  %v449_v50 = vadd.f32 %v448_v46, %v406_v29 }
 0x1c3   :  { %v485_v51 = vmul.f32 0.044677734, %v481_v48  ;;  %v470_v47 = vunpack.c.l.bf16 %v466_v49  ;;  %v455_v52 = vpack.c.bf16 %v449_v50, %v449_v50 }
 0x1c5   :  { %v474_v53 = vmul.f32 %v470_v47, %v1015_v44  ;;  %v1020_v55 = vunpack.c.l.bf16 %v455_v52  ;;  %v489_v56 = vpack.c.bf16 %v485_v51, %v485_v51 }
 0x1c7   :  { %v478_v33 = vpack.c.bf16 %v474_v53, %v474_v53  ;;  %v463_v57 = vmul.f32 %v1020_v55, %v1020_v55  ;;  %v493_v62 = vunpack.c.l.bf16 %v489_v56 }
 0x1c8   :  { %v450_v59 = vpop.f32.mrf.mxu1 }
 0x1c9   :  { %v482_v60 = vunpack.c.l.bf16 %v478_v33  ;;  %v467_v17 = vpack.c.bf16 %v463_v57, %v463_v57  ;;  %v451_v61 = vadd.f32 %v450_v59, %v411_v58  ;;  %v497_v9 = vadd.f32 %v493_v62, %v1010_v35 }
 0x1ca   :  { %v531_v58 = vmul.f32 0.5, %v1020_v55 }
 0x1cb   :  { %v486_v63 = vmul.f32 0.044677734, %v482_v60  ;;  %v471_v0 = vunpack.c.l.bf16 %v467_v17  ;;  %v456_v1 = vpack.c.bf16 %v451_v61, %v451_v61  ;;  %v501_v13 = vpack.c.bf16 %v497_v9, %v497_v9 }
 0x1cd   :  { %v490_v2 = vpack.c.bf16 %v486_v63, %v486_v63  ;;  %v475_v5 = vmul.f32 %v471_v0, %v1020_v55  ;;  %v460_v3 = vunpack.c.l.bf16 %v456_v1  ;;  %v505_v20 = vunpack.c.l.bf16 %v501_v13 }
 0x1ce   :  { %v535_v0 = vpack.c.bf16 %v531_v58, %v531_v58  ;;  %v783_v13 = vmov 65535  }
 0x1cf   :  { %v494_v6 = vunpack.c.l.bf16 %v490_v2  ;;  %v479_v8 = vpack.c.bf16 %v475_v5, %v475_v5  ;;  %v464_v10 = vmul.f32 %v460_v3, %v460_v3  ;;  %v509_v28 = vmul.f32 0.796875, %v505_v20 }
 0x1d0   :  { %v532_v59 = vmul.f32 0.5, %v460_v3  ;;  %v530_v2 = vmul.f32 0.5, %v1015_v44 }
 0x1d1   :  { %v498_v11 = vadd.f32 %v494_v6, %v1015_v44  ;;  %v483_v12 = vunpack.c.l.bf16 %v479_v8  ;;  %v468_v54 = vpack.c.bf16 %v464_v10, %v464_v10  ;;  %v513_v36 = vpack.c.bf16 %v509_v28, %v509_v28  ;;  %v568_v28 = vpop.permute.xlu2 %567 }
 0x1d2   :  { %v536_v1 = vpack.c.bf16 %v532_v59, %v532_v59  ;;  %v529_v10 = vmul.f32 0.5, %v1010_v35 }
 0x1d3   :  { %v502_v7 = vpack.c.bf16 %v498_v11, %v498_v11  ;;  %v487_v14 = vmul.f32 0.044677734, %v483_v12  ;;  %v472_v15 = vunpack.c.l.bf16 %v468_v54  ;;  %v517_v42 = vunpack.c.l.bf16 %v513_v36 }
 0x1d4   :  { %v551_v12 = vunpack.c.l.bf16 %v535_v0 }
 0x1d5   :  { %v506_v16 = vunpack.c.l.bf16 %v502_v7  ;;  %v491_v18 = vpack.c.bf16 %v487_v14, %v487_v14  ;;  %v476_v19 = vmul.f32 %v472_v15, %v460_v3  ;;  %v576_v7 = vsel %vm574_vm3, 4294967295, %v783_v13 }
 0x1d7   :  { %v495_v21 = vunpack.c.l.bf16 %v491_v18  ;;  %v480_v22 = vpack.c.bf16 %v476_v19, %v476_v19  ;;  %v510_v23 = vmul.f32 0.796875, %v506_v16  ;;  %v533_v18 = vpack.c.bf16 %v529_v10, %v529_v10 }
 0x1d8   :  { %v577_v19 = vsel %vm575_vm4, %v576_v7, 0 }
 0x1d9   :  { %v499_v24 = vadd.f32 %v495_v21, %v1020_v55  ;;  %v484_v25 = vunpack.c.l.bf16 %v480_v22  ;;  %v514_v29 = vpack.c.bf16 %v510_v23, %v510_v23  ;;  %v552_v55 = vunpack.c.l.bf16 %v536_v1 }
 0x1da   :  { %v549_v35 = vunpack.c.l.bf16 %v533_v18 }
 0x1db   :  { %v503_v26 = vpack.c.bf16 %v499_v24, %v499_v24  ;;  %v488_v27 = vmul.f32 0.044677734, %v484_v25  ;;  %v518_v37 = vunpack.c.l.bf16 %v514_v29 }
 0x1dd   :  { %v507_v30 = vunpack.c.l.bf16 %v503_v26  ;;  %v492_v31 = vpack.c.bf16 %v488_v27, %v488_v27  ;;  %742 = vtanh.f32 %v518_v37  ;;  %v563_v27 = vld [vmem:[%s1044_s5] sm:$0x7]  ;;  %s784_s5 = smov [#allocation3]  }
 0x1de   :  { %s670_s11 = sshll.u32 %s784_s5, 4  ;;  %s671_s11 = int_to_ptr.vmem [resolvable:$true] %s670_s11 }
 0x1df   :  { %v511_v32 = vmul.f32 0.796875, %v507_v30  ;;  %v496_v34 = vunpack.c.l.bf16 %v492_v31 }
 0x1e1   :  { %v500_v38 = vadd.f32 %v496_v34, %v460_v3  ;;  %v515_v39 = vpack.c.bf16 %v511_v32, %v511_v32  ;;  %v534_v3 = vpack.c.bf16 %v530_v2, %v530_v2 }
 0x1e3   :  { %v504_v40 = vpack.c.bf16 %v500_v38, %v500_v38  ;;  %v519_v41 = vunpack.c.l.bf16 %v515_v39  ;;  %v743_v46 = vpop.eup %742  ;;  %v550_v21 = vunpack.c.l.bf16 %v534_v3 }
 0x1e4   :  { %v526_v52 = vpack.c.bf16 %v743_v46, %v743_v46 }
 0x1e5   :  { %v508_v43 = vunpack.c.l.bf16 %v504_v40  ;;  %744 = vtanh.f32 %v519_v41 }
 0x1e6   :  { %746 = vtanh.f32 %v517_v42  ;;  %v538_v33 = vunpack.c.l.bf16 %v526_v52 }
 0x1e7   :  { %v512_v45 = vmul.f32 0.796875, %v508_v43 }
 0x1e8   :  { %v542_v63 = vadd.f32 1.0, %v538_v33 }
 0x1e9   :  { %v516_v4 = vpack.c.bf16 %v512_v45, %v512_v45 }
 0x1ea   :  { %v546_v11 = vpack.c.bf16 %v542_v63, %v542_v63  ;;  %v627_v63 = vpop.permute.xlu0 %626 }
 0x1eb   :  { %v745_v48 = vpop.eup %744  ;;  %v520_v49 = vunpack.c.l.bf16 %v516_v4 }
 0x1ec   :  { %v527_v50 = vpack.c.bf16 %v745_v48, %v745_v48  ;;  %v747_v51 = vpop.eup %746  ;;  %v554_v44 = vunpack.c.l.bf16 %v546_v11 }
 0x1ed   :  { %748 = vtanh.f32 %v520_v49  ;;  %v525_v53 = vpack.c.bf16 %v747_v51, %v747_v51 }
 0x1ee   :  { %v539_v47 = vunpack.c.l.bf16 %v527_v50  ;;  %v558_v24 = vmul.f32 %v554_v44, %v550_v21 }
 0x1ef   :  { %v537_v17 = vunpack.c.l.bf16 %v525_v53 }
 0x1f0   :  { %v543_v56 = vadd.f32 1.0, %v539_v47 }
 0x1f1   :  { %v541_v9 = vadd.f32 1.0, %v537_v17 }
 0x1f2   :  { %v547_v62 = vpack.c.bf16 %v543_v56, %v543_v56 }
 0x1f3   :  { %v749_v57 = vpop.eup %748  ;;  %v545_v14 = vpack.c.bf16 %v541_v9, %v541_v9 }
 0x1f4   :  { %v528_v60 = vpack.c.bf16 %v749_v57, %v749_v57  ;;  %v555_v8 = vunpack.c.l.bf16 %v547_v62 }
 0x1f5   :  { %v553_v22 = vunpack.c.l.bf16 %v545_v14 }
 0x1f6   :  { %v540_v61 = vunpack.c.l.bf16 %v528_v60  ;;  %v559_v15 = vmul.f32 %v555_v8, %v551_v12  ;;  %v641_v8 = vpop.permute.xlu1 %640 }
 0x1f7   :  { %v557_v25 = vmul.f32 %v553_v22, %v549_v35  ;;  %v643_v11 = vperm.slane %v641_v8, 0 }
 0x1f8   :  { %v544_v5 = vadd.f32 1.0, %v540_v61 }
 0x1f9   :  { %v561_v26 = vpack.c.bf16 %v558_v24, %v557_v25 }
 0x1fa   :  { %v548_v6 = vpack.c.bf16 %v544_v5, %v544_v5 }
 0x1fc   :  { %v556_v54 = vunpack.c.l.bf16 %v548_v6 }
 0x1fe   :  { %v560_v16 = vmul.f32 %v556_v54, %v552_v55 }
 0x200   :  { %v562_v20 = vpack.c.bf16 %v560_v16, %v559_v15 }
 0x202   :  { %v579_v23 = vand.u32 %v577_v19, %v562_v20 }
 0x204   :  { %587 = vmatpush.bf16.msra.mxu2 %v579_v23 }
 0x208   :  { %588 = vmatpush.bf16.msra.mxu2 %v561_v26 }
 0x20b   :  { %707 = vmatmul.msk.bf16.vlgmr.msra.gmra.mxu2 %vm570_vm5, %v563_v27 }
 0x28e   :  { %v590_v29 = vpop.f32.mrf.mxu2 }
 0x28f   :  { %v591_v30 = vadd.f32 %v590_v29, %v568_v28 }
 0x291   :  { %v594_v31 = vpack.c.bf16 %v591_v30, %v591_v30 }
 0x293   :  { %v595_v32 = vunpack.c.l.bf16 %v594_v31 }
 0x295   :  { %v596_v34 = vmul.f32 %v595_v32, %v595_v32  ;;  %v613_v53 = vmul.f32 0.5, %v595_v32 }
 0x296   :  { %v592_v36 = vpop.f32.mrf.mxu2 }
 0x297   :  { %v597_v37 = vpack.c.bf16 %v596_v34, %v596_v34  ;;  %v614_v33 = vpack.c.bf16 %v613_v53, %v613_v53 }
 0x299   :  { %v598_v38 = vunpack.c.l.bf16 %v597_v37  ;;  %v618_v59 = vunpack.c.l.bf16 %v614_v33 }
 0x29b   :  { %v599_v39 = vmul.f32 %v598_v38, %v595_v32 }
 0x29d   :  { %v600_v40 = vpack.c.bf16 %v599_v39, %v599_v39 }
 0x29f   :  { %v601_v41 = vunpack.c.l.bf16 %v600_v40 }
 0x2a1   :  { %v602_v42 = vmul.f32 0.044677734, %v601_v41 }
 0x2a3   :  { %v603_v43 = vpack.c.bf16 %v602_v42, %v602_v42 }
 0x2a5   :  { %v604_v45 = vunpack.c.l.bf16 %v603_v43 }
 0x2a7   :  { %v605_v4 = vadd.f32 %v604_v45, %v595_v32 }
 0x2a9   :  { %v606_v46 = vpack.c.bf16 %v605_v4, %v605_v4 }
 0x2ab   :  { %v607_v48 = vunpack.c.l.bf16 %v606_v46 }
 0x2ad   :  { %v608_v49 = vmul.f32 0.796875, %v607_v48 }
 0x2af   :  { %v609_v50 = vpack.c.bf16 %v608_v49, %v608_v49 }
 0x2b1   :  { %v610_v51 = vunpack.c.l.bf16 %v609_v50 }
 0x2b3   :  { %750 = vtanh.f32 %v610_v51 }
 0x2b9   :  { %v751_v47 = vpop.eup %750 }
 0x2ba   :  { %v612_v52 = vpack.c.bf16 %v751_v47, %v751_v47 }
 0x2bc   :  { %v615_v56 = vunpack.c.l.bf16 %v612_v52 }
 0x2be   :  { %v616_v57 = vadd.f32 1.0, %v615_v56 }
 0x2c0   :  { %v617_v58 = vpack.c.bf16 %v616_v57, %v616_v57 }
 0x2c2   :  { %v619_v60 = vunpack.c.l.bf16 %v617_v58 }
 0x2c4   :  { %v620_v17 = vmul.f32 %v619_v60, %v618_v59 }
 0x2c6   :  { %v621_v61 = vpack.c.bf16 %v620_v17, %v620_v17 }
 0x2c8   :  { %v623_v62 = vunpack.c.l.bf16 %v621_v61 }
 0x2ca   :  { %v629_v0 = vmul.f32 %v627_v63, %v623_v62 }
 0x2cc   :  { %v630_v1 = vsel %vm575_vm4, %v629_v0, 0.0 }
 0x2cd   :  { %v631_v2 = vrot.slane %v630_v1, 4 }
 0x2cf   :  { %v632_v5 = vadd.f32 %v631_v2, %v630_v1 }
 0x2d1   :  { %v633_v9 = vrot.slane %v632_v5, 2 }
 0x2d3   :  { %v634_v6 = vadd.f32 %v633_v9, %v632_v5 }
 0x2d5   :  { %v635_v10 = vrot.slane %v634_v6, 1 }
 0x2d7   :  { %v636_v12 = vadd.f32 %v635_v10, %v634_v6 }
 0x2d9   :  { %v644_v55 = vadd.f32 %v643_v11, %v636_v12 }
 0x2db   :  { %v708_v3 = vmul.f32 -1.442695, %v644_v55 }
 0x2dd   :  { %752 = vpow2.f32 %v708_v3 }
 0x2e3   :  { %v753_v54 = vpop.eup %752 }
 0x2e4   :  { %v648_v13 = vadd.f32 1.0, %v753_v54 }
 0x2e6   :  { %754 = vrcp.f32 %v648_v13  ;;  %v660_v16 = vand.u32 2147483648, %v648_v13  ;;  %v658_v44 = vand.u32 2147483647, %v648_v13  ;;  %vm654_vm7 = vweird.f32 %v648_v13 }
 0x2e8   :  { %v661_v20 = vor.u32 1.1754944e-38, %v660_v16  ;;  %vm659_vm9 = vcmp.eq.f32.partialorder %v658_v44, 8.507059e+37 }
 0x2ec   :  { %v755_v7 = vpop.eup %754 }
 0x2ed   :  { %v650_v14 = vmul.f32 %v755_v7, %v648_v13  ;;  %vm655_vm6 = vweird.f32 %v755_v7 }
 0x2ee   :  { %vm656_vm8 = vmor %vm654_vm7, %vm655_vm6 }
 0x2ef   :  { %v651_v15 = vsub.f32 1.0, %v650_v14 }
 0x2f1   :  { %v652_v18 = vmul.f32 %v755_v7, %v651_v15 }
 0x2f3   :  { %v653_v19 = vadd.f32 %v755_v7, %v652_v18 }
 0x2f5   :  { %v657_v21 = vsel %vm656_vm8, %v755_v7, %v653_v19 }
 0x2f6   :  { %v662_v22 = vsel %vm659_vm9, %v661_v20, %v657_v21 }
 0x2f7   :  { %664 = vst [vmem:[#allocation3] sm:$0x1] %v662_v22 }
 0x2f8   :  { %675 = dma.vmem_to_hbm [thread:$0]  %s671_s11, 16, %s673_s14, [#allocation4]  }
 0x2f9   :  { %780 = dma.done.wait [#allocation4], 16  }
 0x2fa   :  { %781 = vsyncadd [#allocation4], 4294967280 }
 0x2fb   :  { %680 = vsyncpa [#allocation4], 1 }

</bundles_post_ra>
